<compile_context>
chip_gen: v7x
topology: tpu7x:2x2x1
jax: 0.10.0
libtpu: 0.0.40
codegen_flags: <defaults>
</compile_context>

<pallas_src>
import functools
import math

import jax
import jax.numpy as jnp
from jax.experimental import pallas as pl
from jax.experimental.pallas import tpu as pltpu


def _gated_masked_conv_kernel(*refs, n_x_taps, kernel_size, conv_pad, c_out,
                              gx, gc, seq_len, frame_len, zero_stack):
    """One lane-block (several batch frames) per grid step.

    refs (cutoff > 0): pos, x, cond, w_all, out, stack_scratch
    refs (cutoff ==0): pos,    cond, w_all, out, stack_scratch

    pos   : (1, Nt)  int32, within-frame position of every lane
    x     : (C_in,   Nt)
    cond  : (C_cond, Nt)
    w_all : (2*C_out, D) packed weights (w1||w2 / v1||v2 stacked on rows,
            taps as 8-row-aligned column groups)
    out   : (C_out, Nt)
    stack : (D, Nt) VMEM scratch holding the im2col column stack
    """
    if n_x_taps > 0:
        pos_ref, x_ref, c_ref, w_ref, out_ref, stack_ref = refs
    else:
        pos_ref, c_ref, w_ref, out_ref, stack_ref = refs
        x_ref = None

    pos = pos_ref[...]  # (1, Nt) int32

    # Zero once per step so the 8-row group padding never contains garbage
    # (their weight columns are zero, but uninitialised VMEM could be NaN).
    if zero_stack:
        stack_ref[...] = jnp.zeros_like(stack_ref)

    def tap(a, k):
        """Tap-k shifted view of `a` in the folded lane frame, zero outside.

        Output position j reads input index j + k - conv_pad.  The shift is a
        lane rotate (XLU, free slot); lanes whose source falls outside
        [0, seq_len) of their own frame (conv padding / frame boundary) are
        zeroed with a per-lane mask, which also neutralises the rotate's
        wraparound across neighbouring frames.
        """
        d = k - conv_pad
        n = a.shape[-1]
        r = a if d == 0 else pltpu.roll(a, shift=(-d) % n, axis=1)
        need_lo = d < 0                       # j + d >= 0
        need_hi = (seq_len - d) < frame_len   # j + d < seq_len
        if need_lo and need_hi:
            m = (pos >= -d) & (pos < seq_len - d)
        elif need_lo:
            m = pos >= -d
        elif need_hi:
            m = pos < seq_len - d
        else:
            return r
        return r * m.astype(r.dtype)

    # Assemble the im2col stack (8-row-aligned groups -> aligned stores).
    if n_x_taps > 0:
        x = x_ref[...]
        for k in range(n_x_taps):
            stack_ref[k * gx:k * gx + x.shape[0], :] = tap(x, k)
    base = n_x_taps * gx
    c = c_ref[...]
    for k in range(kernel_size):
        stack_ref[base + k * gc:base + k * gc + c.shape[0], :] = tap(c, k)

    # Single MXU matmul for both gates; f32 accumulation.
    h = jnp.dot(w_ref[...], stack_ref[...], preferred_element_type=jnp.float32)
    h1 = h[:c_out]
    h2 = h[c_out:]
    # sigmoid(z) == 0.5 * (tanh(0.5*z) + 1): single EUP transcendental.
    gate = 0.5 * (jnp.tanh(0.5 * h2) + 1.0)
    out_ref[...] = (jnp.tanh(h1) * gate).astype(out_ref.dtype)


def conditioned_gated_masked_conv1d(x, cond, w1, w2, v1, v2, *, mask_type: str,
                                    padding: int):
    """x: (B, C_in, L), cond: (B, C_cond, L); weights in PyTorch layout (O, I, K).

    Returns (B, C_out, L_out), L_out = L + 2*padding - K + 1 (PyTorch conv1d).
    """
    assert mask_type in ("A", "B")
    B, c_in, L = x.shape
    Bc, c_cond, Lc = cond.shape
    assert Bc == B and Lc == L
    c_out, c_in_w, K = w1.shape
    assert c_in_w == c_in
    L_out = L + 2 * padding - K + 1
    assert L_out >= 1

    # Causal mask handled statically: only taps k < cutoff of w1/w2 survive.
    cutoff = K // 2 + (1 if mask_type == "B" else 0)
    n_x_taps = cutoff  # 0 => x path dropped entirely (mask 'A', K == 1)

    # ---- lane-frame geometry -------------------------------------------
    # Each batch element occupies one Lf-wide frame on the lane axis; a grid
    # step covers fpb whole frames so that the block lane width is a multiple
    # of 128 (unmasked vst, native layout for pltpu.roll).
    Lf = max(L, L_out)                      # frame width (== L in the usual case)
    base = math.lcm(Lf, 128) // Lf          # min frames/block for 128-multiple width
    blocks_needed = -(-B // base)
    # Widen blocks toward ~1024 lanes (<= ~16 vregs of f32 accumulator for
    # C_out=8) but keep >= ~4 grid steps when there is enough work so v7x's
    # two TensorCores stay balanced under dimension_semantics=("parallel",).
    width_mult = max(1, min(max(1, 1024 // (base * Lf)),
                            max(1, blocks_needed // 4)))
    fpb = base * width_mult                 # frames per grid step
    n_blocks = -(-B // fpb)
    frames_pad = n_blocks * fpb             # batch padded up to whole blocks
    Nt = fpb * Lf                           # lanes per grid step (128-multiple)
    Np = frames_pad * Lf

    # ---- host-side layout plumbing (one transpose pass; the small frame /
    # alignment pad fuses into it — there is NO separate conv-padding pass).
    def fold(a):
        a = jnp.transpose(a, (1, 0, 2))     # (C, B, L)
        if frames_pad != B or Lf != L:
            a = jnp.pad(a, ((0, 0), (0, frames_pad - B), (0, Lf - L)))
        return a.reshape(a.shape[0], Np)

    cf = fold(cond)
    xf = fold(x) if n_x_taps > 0 else None

    # Within-frame position of each lane (same pattern for every block since
    # Nt is a whole number of frames) — avoids an in-kernel integer modulo.
    pos = (jnp.arange(Nt, dtype=jnp.int32) % Lf).reshape(1, Nt)

    # ---- pack weights: one (2*C_out, D) matrix; taps as 8-row-aligned
    # column groups matching the in-kernel stack layout; gate1 rows [0:C_out],
    # gate2 rows [C_out:2*C_out].
    gx = -(-c_in // 8) * 8
    gc = -(-c_cond // 8) * 8
    parts = []
    if n_x_taps > 0:
        w12 = jnp.concatenate([w1, w2], axis=0)[:, :, :n_x_taps]   # (2C, Cin, nx)
        w12 = jnp.pad(w12, ((0, 0), (0, gx - c_in), (0, 0)))
        parts.append(jnp.transpose(w12, (0, 2, 1)).reshape(2 * c_out, n_x_taps * gx))
    v12 = jnp.concatenate([v1, v2], axis=0)                         # (2C, Cc, K)
    v12 = jnp.pad(v12, ((0, 0), (0, gc - c_cond), (0, 0)))
    parts.append(jnp.transpose(v12, (0, 2, 1)).reshape(2 * c_out, K * gc))
    w_all = parts[0] if len(parts) == 1 else jnp.concatenate(parts, axis=1)
    D = n_x_taps * gx + K * gc

    kernel = functools.partial(
        _gated_masked_conv_kernel,
        n_x_taps=n_x_taps, kernel_size=K, conv_pad=padding, c_out=c_out,
        gx=gx, gc=gc, seq_len=L, frame_len=Lf,
        zero_stack=(gx != c_in or gc != c_cond))

    in_specs = [pl.BlockSpec((1, Nt), lambda n: (0, 0))]        # pos (resident)
    inputs = [pos]
    if n_x_taps > 0:
        in_specs.append(pl.BlockSpec((c_in, Nt), lambda n: (0, n)))
        inputs.append(xf)
    in_specs.append(pl.BlockSpec((c_cond, Nt), lambda n: (0, n)))
    inputs.append(cf)
    in_specs.append(pl.BlockSpec((2 * c_out, D), lambda n: (0, 0)))  # weights resident
    inputs.append(w_all)

    out_f = pl.pallas_call(
        kernel,
        out_shape=jax.ShapeDtypeStruct((c_out, Np), x.dtype),
        grid=(n_blocks,),
        in_specs=in_specs,
        out_specs=pl.BlockSpec((c_out, Nt), lambda n: (0, n)),
        scratch_shapes=[pltpu.VMEM((D, Nt), x.dtype)],
        compiler_params=pltpu.CompilerParams(
            dimension_semantics=("parallel",)),
    )(*inputs)

    # Un-fold: (C_out, frames*Lf) -> (B, C_out, L_out)  (layout plumbing only).
    out = out_f.reshape(c_out, frames_pad, Lf)[:, :B, :L_out]
    return jnp.transpose(out, (1, 0, 2))


# ----------------------------- reference ---------------------------------
def _make_mask(out_ch, in_ch, kernel_size, mask_type):
    cutoff = kernel_size // 2 + (1 if mask_type == "B" else 0)
    taps = (jnp.arange(kernel_size) < cutoff).astype(jnp.float32)
    return jnp.broadcast_to(taps[None, None, :], (out_ch, in_ch, kernel_size))


def _reference(x, cond, w1, w2, v1, v2, *, mask_type, padding):
    """Pure-JAX reference (identical math, no Pallas) for correctness check."""
    c_out, c_in, K = w1.shape
    mask = _make_mask(c_out, c_in, K, mask_type)
    w1m, w2m = w1 * mask, w2 * mask
    B, _, L = x.shape
    L_out = L + 2 * padding - K + 1

    def conv(inp, w):
        ip = jnp.pad(inp, ((0, 0), (0, 0), (padding, padding)))
        acc = jnp.zeros((B, w.shape[0], L_out), jnp.float32)
        for k in range(K):
            acc = acc + jnp.einsum("bil,oi->bol", ip[:, :, k:k + L_out], w[:, :, k])
        return acc

    h1 = conv(x, w1m) + conv(cond, v1)
    h2 = conv(x, w2m) + conv(cond, v2)
    return (jnp.tanh(h1) * jax.nn.sigmoid(h2)).astype(x.dtype)


if __name__ == "__main__":
    # Module hyperparameters (small, consistent with the PyTorch __init__).
    mask_type = "B"
    input_channel = 4
    output_channel = 8
    kernel_size = 3
    padding = 1
    conditional_embedding_dim = 6

    B, L = 2, 16

    key = jax.random.PRNGKey(0)
    kx, kc, k1, k2, k3, k4 = jax.random.split(key, 6)

    x = jax.random.normal(kx, (B, input_channel, L), jnp.float32)
    cond = jax.random.normal(kc, (B, conditional_embedding_dim, L), jnp.float32)

    # Deterministic synthetic weights in PyTorch Conv1d layout (O, I, K), bias=False.
    w1 = 0.1 * jax.random.normal(k1, (output_channel, input_channel, kernel_size), jnp.float32)
    w2 = 0.1 * jax.random.normal(k2, (output_channel, input_channel, kernel_size), jnp.float32)
    v1 = 0.1 * jax.random.normal(k3, (output_channel, conditional_embedding_dim, kernel_size), jnp.float32)
    v2 = 0.1 * jax.random.normal(k4, (output_channel, conditional_embedding_dim, kernel_size), jnp.float32)

    out = conditioned_gated_masked_conv1d(
        x, cond, w1, w2, v1, v2, mask_type=mask_type, padding=padding)
    out = jax.block_until_ready(out)

    ref = _reference(x, cond, w1, w2, v1, v2, mask_type=mask_type, padding=padding)
    assert out.shape == (B, output_channel, L), out.shape
    assert jnp.allclose(out, ref, atol=1e-5, rtol=1e-5), \
        float(jnp.max(jnp.abs(out - ref)))

    print("KERNEL_OK")
</pallas_src>

<mosaic_0001>
module attributes {stable_mosaic.version = 11 : i64} {
  func.func @_gated_masked_conv_kernel(%arg0: i32, %arg1: memref<1x128xi32, #tpu.memory_space<vmem>>, %arg2: memref<4x128xf32, #tpu.memory_space<vmem>>, %arg3: memref<6x128xf32, #tpu.memory_space<vmem>>, %arg4: memref<16x40xf32, #tpu.memory_space<vmem>>, %arg5: memref<8x128xf32, #tpu.memory_space<vmem>>, %arg6: memref<40x128xf32, #tpu.memory_space<vmem>>) attributes {dimension_semantics = [#tpu.dimension_semantics<parallel>], iteration_bounds = array<i64: 1>, scalar_prefetch = 0 : i64, scratch_operands = 1 : i64, tpu.core_type = #tpu.core_type<tc>, window_params = [{pipeline_mode = #tpu.pipeline_mode<synchronous>, transform_indices = @transform_0, window_bounds = array<i64: 1, 128>}, {transform_indices = @transform_1, window_bounds = array<i64: 4, 128>}, {transform_indices = @transform_2, window_bounds = array<i64: 6, 128>}, {pipeline_mode = #tpu.pipeline_mode<synchronous>, transform_indices = @transform_3, window_bounds = array<i64: 16, 40>}, {transform_indices = @transform_4, window_bounds = array<i64: 8, 128>}]} {
    %c0 = arith.constant 0 : index
    %c0_0 = arith.constant 0 : index
    %0 = vector.load %arg1[%c0, %c0_0] : memref<1x128xi32, #tpu.memory_space<vmem>>, vector<1x128xi32>
    %cst = arith.constant 0.000000e+00 : f32
    %1 = vector.broadcast %cst : f32 to vector<40x128xf32>
    %c0_1 = arith.constant 0 : index
    %c0_2 = arith.constant 0 : index
    %2 = vector.load %arg6[%c0_1, %c0_2] : memref<40x128xf32, #tpu.memory_space<vmem>>, vector<40x128xf32>
    tpu.vector_store %arg6[%c0_1, %c0_2], %1 {strides = array<i32>} : memref<40x128xf32, #tpu.memory_space<vmem>>, vector<40x128xf32>,
    %c0_3 = arith.constant 0 : index
    %c0_4 = arith.constant 0 : index
    %3 = vector.load %arg2[%c0_3, %c0_4] : memref<4x128xf32, #tpu.memory_space<vmem>>, vector<4x128xf32>
    %c1_i32 = arith.constant 1 : i32
    %4 = tpu.dynamic_rotate %3 by %c1_i32 dim 1 : vector<4x128xf32>, i32 -> vector<4x128xf32>
    %c1_i32_5 = arith.constant 1 : i32
    %5 = vector.broadcast %c1_i32_5 : i32 to vector<1x128xi32>
    %6 = arith.cmpi sge, %0, %5 : vector<1x128xi32>
    %7 = arith.extui %6 : vector<1x128xi1> to vector<1x128xi32>
    %8 = arith.sitofp %7 : vector<1x128xi32> to vector<1x128xf32>
    %9 = vector.broadcast %8 : vector<1x128xf32> to vector<4x128xf32>
    %10 = arith.mulf %4, %9 : vector<4x128xf32>
    %c0_6 = arith.constant 0 : index
    %c0_7 = arith.constant 0 : index
    %11 = vector.load %arg6[%c0_6, %c0_7] : memref<40x128xf32, #tpu.memory_space<vmem>>, vector<4x128xf32>
    tpu.vector_store %arg6[%c0_6, %c0_7], %10 {strides = array<i32>} : memref<40x128xf32, #tpu.memory_space<vmem>>, vector<4x128xf32>,
    %c8 = arith.constant 8 : index
    %c0_8 = arith.constant 0 : index
    %12 = vector.load %arg6[%c8, %c0_8] : memref<40x128xf32, #tpu.memory_space<vmem>>, vector<4x128xf32>
    tpu.vector_store %arg6[%c8, %c0_8], %3 {strides = array<i32>} : memref<40x128xf32, #tpu.memory_space<vmem>>, vector<4x128xf32>,
    %c0_9 = arith.constant 0 : index
    %c0_10 = arith.constant 0 : index
    %13 = vector.load %arg3[%c0_9, %c0_10] : memref<6x128xf32, #tpu.memory_space<vmem>>, vector<6x128xf32>
    %c1_i32_11 = arith.constant 1 : i32
    %14 = tpu.dynamic_rotate %13 by %c1_i32_11 dim 1 : vector<6x128xf32>, i32 -> vector<6x128xf32>
    %c1_i32_12 = arith.constant 1 : i32
    %15 = vector.broadcast %c1_i32_12 : i32 to vector<1x128xi32>
    %16 = arith.cmpi sge, %0, %15 : vector<1x128xi32>
    %17 = arith.extui %16 : vector<1x128xi1> to vector<1x128xi32>
    %18 = arith.sitofp %17 : vector<1x128xi32> to vector<1x128xf32>
    %19 = vector.broadcast %18 : vector<1x128xf32> to vector<6x128xf32>
    %20 = arith.mulf %14, %19 : vector<6x128xf32>
    %c16 = arith.constant 16 : index
    %c0_13 = arith.constant 0 : index
    %21 = vector.load %arg6[%c16, %c0_13] : memref<40x128xf32, #tpu.memory_space<vmem>>, vector<6x128xf32>
    tpu.vector_store %arg6[%c16, %c0_13], %20 {strides = array<i32>} : memref<40x128xf32, #tpu.memory_space<vmem>>, vector<6x128xf32>,
    %c24 = arith.constant 24 : index
    %c0_14 = arith.constant 0 : index
    %22 = vector.load %arg6[%c24, %c0_14] : memref<40x128xf32, #tpu.memory_space<vmem>>, vector<6x128xf32>
    tpu.vector_store %arg6[%c24, %c0_14], %13 {strides = array<i32>} : memref<40x128xf32, #tpu.memory_space<vmem>>, vector<6x128xf32>,
    %c127_i32 = arith.constant 127 : i32
    %23 = tpu.dynamic_rotate %13 by %c127_i32 dim 1 : vector<6x128xf32>, i32 -> vector<6x128xf32>
    %c15_i32 = arith.constant 15 : i32
    %24 = vector.broadcast %c15_i32 : i32 to vector<1x128xi32>
    %25 = arith.cmpi slt, %0, %24 : vector<1x128xi32>
    %26 = arith.extui %25 : vector<1x128xi1> to vector<1x128xi32>
    %27 = arith.sitofp %26 : vector<1x128xi32> to vector<1x128xf32>
    %28 = vector.broadcast %27 : vector<1x128xf32> to vector<6x128xf32>
    %29 = arith.mulf %23, %28 : vector<6x128xf32>
    %c32 = arith.constant 32 : index
    %c0_15 = arith.constant 0 : index
    %30 = vector.load %arg6[%c32, %c0_15] : memref<40x128xf32, #tpu.memory_space<vmem>>, vector<6x128xf32>
    tpu.vector_store %arg6[%c32, %c0_15], %29 {strides = array<i32>} : memref<40x128xf32, #tpu.memory_space<vmem>>, vector<6x128xf32>,
    %c0_16 = arith.constant 0 : index
    %c0_17 = arith.constant 0 : index
    %31 = vector.load %arg4[%c0_16, %c0_17] : memref<16x40xf32, #tpu.memory_space<vmem>>, vector<16x40xf32>
    %c0_18 = arith.constant 0 : index
    %c0_19 = arith.constant 0 : index
    %32 = vector.load %arg6[%c0_18, %c0_19] : memref<40x128xf32, #tpu.memory_space<vmem>>, vector<40x128xf32>
    %cst_20 = arith.constant dense<0.000000e+00> : vector<16x128xf32>
    %33 = tpu.matmul %31, %32, %cst_20 {dimension_numbers = #tpu.dot_dimension_numbers<[1], [0], [0], [1], [0, 0, 1, 1], [], []>} : vector<16x40xf32>, vector<40x128xf32>, vector<16x128xf32> -> vector<16x128xf32>
    %34 = vector.extract_strided_slice %33 {offsets = [0, 0], sizes = [8, 128], strides = [1, 1]} : vector<16x128xf32> to vector<8x128xf32>
    %35 = vector.extract_strided_slice %33 {offsets = [8, 0], sizes = [8, 128], strides = [1, 1]} : vector<16x128xf32> to vector<8x128xf32>
    %cst_21 = arith.constant 5.000000e-01 : f32
    %36 = vector.broadcast %cst_21 : f32 to vector<8x128xf32>
    %37 = arith.mulf %36, %35 : vector<8x128xf32>
    %38 = math.tanh %37 : vector<8x128xf32>
    %cst_22 = arith.constant 1.000000e+00 : f32
    %39 = vector.broadcast %cst_22 : f32 to vector<8x128xf32>
    %40 = arith.addf %38, %39 : vector<8x128xf32>
    %cst_23 = arith.constant 5.000000e-01 : f32
    %41 = vector.broadcast %cst_23 : f32 to vector<8x128xf32>
    %42 = arith.mulf %41, %40 : vector<8x128xf32>
    %43 = math.tanh %34 : vector<8x128xf32>
    %44 = arith.mulf %43, %42 : vector<8x128xf32>
    %c0_24 = arith.constant 0 : index
    %c0_25 = arith.constant 0 : index
    %45 = vector.load %arg5[%c0_24, %c0_25] : memref<8x128xf32, #tpu.memory_space<vmem>>, vector<8x128xf32>
    tpu.vector_store %arg5[%c0_24, %c0_25], %44 {strides = array<i32>} : memref<8x128xf32, #tpu.memory_space<vmem>>, vector<8x128xf32>,
    return
  }
  func.func @transform_0(%arg0: i32) -> (i32, i32) {
    %c0_i32 = arith.constant 0 : i32
    %c0_i32_0 = arith.constant 0 : i32
    %c0_i32_1 = arith.constant 0 : i32
    return %c0_i32, %c0_i32_0 : i32, i32
  }
  func.func @transform_1(%arg0: i32) -> (i32, i32) {
    %c0_i32 = arith.constant 0 : i32
    %c0_i32_0 = arith.constant 0 : i32
    return %c0_i32, %arg0 : i32, i32
  }
  func.func @transform_2(%arg0: i32) -> (i32, i32) {
    %c0_i32 = arith.constant 0 : i32
    %c0_i32_0 = arith.constant 0 : i32
    return %c0_i32, %arg0 : i32, i32
  }
  func.func @transform_3(%arg0: i32) -> (i32, i32) {
    %c0_i32 = arith.constant 0 : i32
    %c0_i32_0 = arith.constant 0 : i32
    %c0_i32_1 = arith.constant 0 : i32
    return %c0_i32, %c0_i32_0 : i32, i32
  }
  func.func @transform_4(%arg0: i32) -> (i32, i32) {
    %c0_i32 = arith.constant 0 : i32
    %c0_i32_0 = arith.constant 0 : i32
    return %c0_i32, %arg0 : i32, i32
  }
}

</mosaic_0001>

<bundles_post_ra>
// kernel: tpu_custom_call.1
= control target key start
LH: loop header
LB: loop body
LE: loop exit
PB: predicated region body
PF: predicated region fallthrough
CT: control target
= control target key end

     0   :  { %9 = vsyncpa [#allocation4], 0  ;;  %s488_s0 = inlined_call_operand.hbm [shape: s32[1,128], index: 0, kind: input, shape index: {}]   ;;  %s489_s1 = inlined_call_operand.hbm [shape: f32[4,128], index: 1, kind: input, shape index: {}]   ;;  %s490_s2 = inlined_call_operand.hbm [shape: f32[6,128], index: 2, kind: input, shape index: {}]   ;;  %s491_s3 = inlined_call_operand.hbm [shape: f32[16,40], index: 3, kind: input, shape index: {}]   ;;  %s492_s4 = inlined_call_operand.hbm [shape: f32[8,128], index: 4, kind: output, shape index: {}]  }
   0x1   :  { %10 = vsyncpa [#allocation7], 0 }
   0x2   :  { %11 = vsyncpa [#allocation10], 0 }
   0x3   :  { %12 = vsyncpa [#allocation5], 0  ;;  %s384_s15 = smov [#allocation6]   ;;  %s385_s17 = smov [#allocation3]  }
   0x4   :  { %s29_s16 = sshll.u32 %s384_s15, 4  ;;  %s19_s18 = sshll.u32 %s385_s17, 4  ;;  %s30_s16 = int_to_ptr.vmem [resolvable:$true] %s29_s16  ;;  %s20_s18 = int_to_ptr.vmem [resolvable:$true] %s19_s18 }
   0x5   :  { %s266_s21 = scalar_lea.hbm %s489_s1, 64 }
   0x6   :  { %p267_p0 = scmp.ne.s32.totalorder %s489_s1, %s266_s21  ;;  %p270_p1 = scmp.lt.u32.totalorder %s266_s21, %s489_s1 }
   0x8   :  { %p272_p2 = pnand %p270_p1, %p267_p0 }
   0xa   :  { %275 = shalt.err (!%p272_p2)
}
   0xb   :  { %s276_s26 = scalar_lea.vmem %s30_s16, 64  ;;  %p281_p4 = scmp.lt.s32.totalorder %s30_s16, %s30_s16 }
   0xc   :  { %p277_p3 = scmp.ne.s32.totalorder %s30_s16, %s276_s26  ;;  %p282_p5 = scmp.lt.s32.totalorder %s276_s26, %s276_s26 }
   0xe   :  { %p283_p6 = por %p282_p5, %p281_p4 }
  0x10   :  { %p284_p7 = pnand %p283_p6, %p277_p3 }
  0x12   :  { %287 = shalt.err (!%p284_p7)
}
  0x13   :  { %32 = dma.hbm_to_vmem [thread:$0]  %s489_s1, 64, %s30_s16, [#allocation7]  }
  0x14   :  { %s288_s5 = scalar_lea.hbm %s488_s0, 16 }
  0x15   :  { %p289_p8 = scmp.ne.s32.totalorder %s488_s0, %s288_s5  ;;  %p292_p9 = scmp.lt.u32.totalorder %s288_s5, %s488_s0 }
  0x17   :  { %p294_p10 = pnand %p292_p9, %p289_p8 }
  0x19   :  { %297 = shalt.err (!%p294_p10)
}
  0x1a   :  { %s298_s10 = scalar_lea.vmem %s20_s18, 16  ;;  %s302_s11 = scalar_lea.vmem %s20_s18, 32 }
  0x1b   :  { %p299_p11 = scmp.ne.s32.totalorder %s20_s18, %s298_s10  ;;  %p303_p12 = scmp.lt.s32.totalorder %s20_s18, %s20_s18 }
  0x1c   :  { %p304_p13 = scmp.lt.s32.totalorder %s302_s11, %s298_s10 }
  0x1e   :  { %p305_p0 = por %p304_p13, %p303_p12 }
  0x20   :  { %p306_p1 = pnand %p305_p0, %p299_p11 }
  0x22   :  { %309 = shalt.err (!%p306_p1)
}
  0x23   :  { %22 = dma.hbm_to_vmem [thread:$0]  %s488_s0, 16, %s20_s18, [#allocation4]  }
  0x24   :  { %s386_s13 = smov [#allocation8]   ;;  %s387_s15 = smov [#allocation9]  }
  0x25   :  { %s39_s14 = sshll.u32 %s386_s13, 4  ;;  %s48_s16 = sshll.u32 %s387_s15, 4  ;;  %s40_s14 = int_to_ptr.vmem [resolvable:$true] %s39_s14  ;;  %s443_s16 = int_to_ptr.vmem [resolvable:$true] %s48_s16 }
  0x26   :  { %s310_s20 = scalar_lea.hbm %s490_s2, 128 }
  0x27   :  { %p311_p2 = scmp.ne.s32.totalorder %s490_s2, %s310_s20  ;;  %p314_p3 = scmp.lt.u32.totalorder %s310_s20, %s490_s2 }
  0x29   :  { %p316_p4 = pnand %p314_p3, %p311_p2 }
  0x2b   :  { %319 = shalt.err (!%p316_p4)
}
  0x2c   :  { %s320_s0 = scalar_lea.vmem %s40_s14, 128  ;;  %p325_p6 = scmp.lt.s32.totalorder %s40_s14, %s40_s14 }
  0x2d   :  { %p321_p5 = scmp.ne.s32.totalorder %s40_s14, %s320_s0  ;;  %p326_p7 = scmp.lt.s32.totalorder %s320_s0, %s320_s0 }
  0x2f   :  { %p327_p8 = por %p326_p7, %p325_p6 }
  0x31   :  { %p328_p9 = pnand %p327_p8, %p321_p5 }
  0x33   :  { %331 = shalt.err (!%p328_p9)
}
  0x34   :  { %42 = dma.hbm_to_vmem [thread:$0]  %s490_s2, 128, %s40_s14, [#allocation7]  }
  0x35   :  { %s332_s28 = scalar_lea.hbm %s491_s3, 256 }
  0x36   :  { %p333_p10 = scmp.ne.s32.totalorder %s491_s3, %s332_s28  ;;  %p336_p11 = scmp.lt.u32.totalorder %s332_s28, %s491_s3 }
  0x38   :  { %p338_p12 = pnand %p336_p11, %p333_p10 }
  0x3a   :  { %341 = shalt.err (!%p338_p12)
}
  0x3b   :  { %s342_s7 = scalar_lea.vmem %s443_s16, 256  ;;  %p347_p0 = scmp.lt.s32.totalorder %s443_s16, %s443_s16 }
  0x3c   :  { %p343_p13 = scmp.ne.s32.totalorder %s443_s16, %s342_s7  ;;  %p348_p1 = scmp.lt.s32.totalorder %s342_s7, %s342_s7 }
  0x3e   :  { %p349_p2 = por %p348_p1, %p347_p0 }
  0x40   :  { %p350_p3 = pnand %p349_p2, %p343_p13 }
  0x42   :  { %353 = shalt.err (!%p350_p3)
}
  0x43   :  { %s388_s2 = smov 128   ;;  %s389_s8 = smov 8  }
  0x44   :  { %54 = dma.hbm_to_vmem [thread:$0]  %s491_s3, 256, %s443_s16, [#allocation10], %s388_s2, %s388_s2, %s389_s8  }
  0x45   :  { %376 = dma.done.wait [#allocation4], 16  }
  0x46   :  { %377 = vsyncadd [#allocation4], 4294967280 }
  0x47   :  { %378 = dma.done.wait [#allocation7], 192  }
  0x48   :  { %379 = vsyncadd [#allocation7], 4294967104 }
  0x49   :  { %380 = dma.done.wait [#allocation10], 256  }
  0x4a   :  { %381 = vsyncadd [#allocation10], 4294967040  ;;  %v390_v0 = vmov 0.0   ;;  %v73_v1 = vld [vmem:[#allocation6] sm:$0xf]  ;;  %s391_s11 = smov 1   ;;  %v80_v4 = vlaneseq }
  0x4b   :  { %69 = vst [vmem:[#allocation2 + $0x8] sm:$0xff] %v390_v0  ;;  %68 = vst [vmem:[#allocation2] sm:$0xff] %v390_v0  ;;  %v88_v2 = vld [vmem:[#allocation8] sm:$0x3f]  ;;  %74 = vrot.lane.b32.xlu0 %v73_v1, %s391_s11  ;;  %s392_s1 = smov 127   ;;  %v107_v3 = vld [vmem:[#allocation9] sm:$0xff] }
  0x4c   :  { %70 = vst [vmem:[#allocation2 + $0x10] sm:$0xff] %v390_v0  ;;  %71 = vst [vmem:[#allocation2 + $0x18] sm:$0xff] %v390_v0  ;;  %94 = vrot.lane.b32.xlu1 %v88_v2, %s392_s1  ;;  %vm114_vm0 = vcmask 326656   ;;  %v67_v5 = vld [vmem:[#allocation3] sm:$0x1]  ;;  %v81_v6 = vshrl.u32 %v80_v4, 7 }
  0x4d   :  { %72 = vst [vmem:[#allocation2 + $0x20] sm:$0xff] %v390_v0  ;;  %87 = vst [vmem:[#allocation2 + $0x8] sm:$0xf] %v73_v1  ;;  %241 = vmatprep.mubr.msk.f32.mxu0 %vm114_vm0, %v107_v3  ;;  %vm76_vm1 = vcmp.ge.s32.totalorder %v67_v5, 1  ;;  %vm96_vm2 = vcmp.lt.s32.totalorder %v67_v5, 15  ;;  %v108_v25 = vld [vmem:[#allocation9 + $0x8] sm:$0xff] }
  0x4e   :  { %93 = vst [vmem:[#allocation2 + $0x18] sm:$0x3f] %v88_v2  ;;  %v82_v7 = vsub.s32 0, %v81_v6  ;;  %v220_v8 = vsel %vm76_vm1, 1.0, %v390_v0  ;;  %v221_v9 = vsel %vm96_vm2, 1.0, %v390_v0  ;;  %s393_s3 = smov [#allocation11]  }
  0x4f   :  { %89 = vrot.lane.b32.xlu0 %v88_v2, %s391_s11  ;;  %s209_s12 = sshll.u32 %s393_s3, 4  ;;  %s210_s12 = int_to_ptr.vmem [resolvable:$true] %s209_s12 }
  0x50   :  { %v83_v10 = vrot.slane %v220_v8, %v82_v7  ;;  %v103_v11 = vrot.slane %v221_v9, %v82_v7  ;;  %s354_s13 = scalar_lea.vmem %s210_s12, 128  ;;  %p359_p5 = scmp.lt.s32.totalorder %s210_s12, %s210_s12 }
  0x51   :  { %p355_p4 = scmp.ne.s32.totalorder %s210_s12, %s354_s13  ;;  %p360_p6 = scmp.lt.s32.totalorder %s354_s13, %s354_s13 }
  0x53   :  { %p361_p7 = por %p360_p6, %p359_p5 }
  0x54   :  { %v110_v18 = vld [vmem:[#allocation2 + $0x8] sm:$0xff] }
  0x55   :  { %v112_v21 = vld [vmem:[#allocation2 + $0x18] sm:$0xff]  ;;  %p362_p8 = pnand %p361_p7, %p355_p4 }
  0xbd   :  { %v75_v12 = vpop.permute.xlu0 %74 }
  0xbe   :  { %v95_v13 = vpop.permute.xlu1 %94  ;;  %v85_v14 = vmul.f32 %v83_v10, %v75_v12 }
  0xbf   :  { %v105_v15 = vmul.f32 %v103_v11, %v95_v13 }
  0xc0   :  { %86 = vst [vmem:[#allocation2] sm:$0xf] %v85_v14 }
  0xc1   :  { %106 = vst [vmem:[#allocation2 + $0x20] sm:$0x3f] %v105_v15  ;;  %v90_v16 = vpop.permute.xlu0 %89 }
  0xc2   :  { %v91_v17 = vmul.f32 %v90_v16, %v83_v10 }
  0xc4   :  { %92 = vst [vmem:[#allocation2 + $0x10] sm:$0x3f] %v91_v17 }
  0xc7   :  { %v109_v19 = vld [vmem:[#allocation2] sm:$0xff] }
  0xc8   :  { %v244_v20 = vpack.c.bf16 %v110_v18, %v109_v19  ;;  %v113_v24 = vld [vmem:[#allocation2 + $0x20] sm:$0xff] }
  0xca   :  { %245 = vmatprep.subr.bf16.mxu0 %v244_v20 }
  0xcb   :  { %247 = vmatpush3.bf16.msra.mxu0 %v244_v20  ;;  %v111_v22 = vld [vmem:[#allocation2 + $0x10] sm:$0xff] }
  0xcc   :  { %v248_v23 = vpack.c.bf16 %v112_v21, %v111_v22 }
  0xce   :  { %249 = vmatprep.subr.bf16.mxu0 %v248_v23 }
  0xcf   :  { %251 = vmatpush3.bf16.msra.mxu0 %v248_v23 }
  0xd0   :  { %239 = vmatprep.subr.mxu0 %v113_v24 }
  0xd3   :  { %240 = vmatpush3.msra.mxu0 %v113_v24 }
  0xd4   :  { %242 = vmatmul.mubr.msk.f32.vlgmr.msra.gmra.mrb[0].mxu0 %vm114_vm0, %v108_v25 }
 0x1a7   :  { %v243_v26 = vpop.f32.mrb[0].mxu0 }
 0x1a8   :  { %v196_v27 = vmul.f32 0.5, %v243_v26  ;;  %v187_v28 = vpop.f32.mrb[1].mxu0 }
 0x1aa   :  { %262 = vtanh.f32 %v196_v27 }
 0x1ab   :  { %264 = vtanh.f32 %v187_v28 }
 0x1b4   :  { %v263_v29 = vpop.eup %262 }
 0x1b5   :  { %v198_v30 = vadd.f32 1.0, %v263_v29  ;;  %v265_v32 = vpop.eup %264 }
 0x1b7   :  { %v199_v31 = vmul.f32 0.5, %v198_v30 }
 0x1b9   :  { %v201_v33 = vmul.f32 %v265_v32, %v199_v31 }
 0x1bb   :  { %202 = vst [vmem:[#allocation11] sm:$0xff] %v201_v33 }
 0x1bc   :  { %365 = shalt.err (!%p362_p8)
}
 0x1bd   :  { %s366_s16 = scalar_lea.hbm %s492_s4, 128 }
 0x1be   :  { %p367_p9 = scmp.ne.s32.totalorder %s492_s4, %s366_s16  ;;  %p370_p10 = scmp.lt.u32.totalorder %s366_s16, %s492_s4 }
 0x1c0   :  { %p372_p11 = pnand %p370_p10, %p367_p9 }
 0x1c2   :  { %375 = shalt.err (!%p372_p11)
}
 0x1c3   :  { %212 = dma.vmem_to_hbm [thread:$0]  %s210_s12, 128, %s492_s4, [#allocation5]  }
 0x1c4   :  { %382 = dma.done.wait [#allocation5], 128  }
 0x1c5   :  { %383 = vsyncadd [#allocation5], 4294967168 }
 0x1c6   :  { %216 = vsyncpa [#allocation4], 1 }
 0x1c7   :  { %217 = vsyncpa [#allocation7], 1 }
 0x1c8   :  { %218 = vsyncpa [#allocation10], 1 }
 0x1c9   :  { %219 = vsyncpa [#allocation5], 1 }

</bundles_post_ra>
